<compile_context>
chip_gen: v6e
topology: v6e:2x2x1
jax: 0.10.0
libtpu: 0.0.40
codegen_flags: <defaults>
</compile_context>

<pallas_src>
import math
import functools

import jax
import jax.numpy as jnp
from jax.experimental import pallas as pl
from jax.experimental.pallas import tpu as pltpu


def _round_up(x, m):
    return (x + m - 1) // m * m


def ffn_kernel(x_ref, w1_ref, b1_ref, w2_ref, b2_ref, o_ref, acc_ref):
    # x_ref:  (tm, Dp)      compute dtype (bf16 recommended)
    # w1_ref: (Dp, tff)     compute dtype
    # b1_ref: (1, tff)      f32
    # w2_ref: (tff, Dp)     compute dtype
    # b2_ref: (1, Dp)       f32
    # o_ref:  (tm, Dp)      output dtype
    # acc_ref:(tm, Dp)      f32 VMEM accumulator over d_ff chunks
    k = pl.program_id(1)

    @pl.when(k == 0)
    def _():
        acc_ref[...] = jnp.zeros_like(acc_ref)

    # linear1 chunk: MXU consumes its native (bf16) inputs with f32 accumulation.
    h = jnp.dot(x_ref[...], w1_ref[...], preferred_element_type=jnp.float32)
    h = h + b1_ref[...].astype(jnp.float32)

    # Gelu (tanh approximation); tanh lowers to the EUP slot, math in f32.
    g = jax.nn.gelu(h, approximate=True)

    # TODO(synk): dropout is identity (inference / eval mode); training-mode
    # dropout would use pltpu.prng_seed / pltpu.prng_random_bits.

    # linear2 partial product, accumulated across the d_ff chunks.
    acc_ref[...] += jnp.dot(g.astype(w2_ref.dtype), w2_ref[...],
                            preferred_element_type=jnp.float32)

    @pl.when(k == pl.num_programs(1) - 1)
    def _():
        o_ref[...] = (acc_ref[...] +
                      b2_ref[...].astype(jnp.float32)).astype(o_ref.dtype)


def _auto_tff(d_model_p, d_ff, tm, compute_bytes, out_bytes,
              vmem_budget=40 * 1024 * 1024):
    """Largest d_ff chunk (multiple of 128) whose pipelined VMEM footprint fits.

    Fewer chunks is better: with K == 1 the weight block index is constant
    across the whole grid, so the weights are loaded from HBM once and reused
    for every row tile.
    """
    def vmem_bytes(tff):
        dbuf = 2  # BlockSpec double-buffering of pipelined inputs/outputs
        x_tile = tm * d_model_p * compute_bytes
        w1c = d_model_p * tff * compute_bytes
        b1c = tff * 4
        w2c = tff * d_model_p * compute_bytes
        b2c = d_model_p * 4
        out_tile = tm * d_model_p * out_bytes
        acc = tm * d_model_p * 4
        return dbuf * (x_tile + w1c + b1c + w2c + b2c + out_tile) + acc

    tff = _round_up(d_ff, 128)
    while tff > 128 and vmem_bytes(tff) > vmem_budget:
        tff = _round_up(tff // 2, 128)
    return tff


def feed_forward(x, w1, b1, w2, b2, *, tm=256, tff=None):
    """x: [batch, seq, d_model] -> [batch, seq, d_model]."""
    batch, seq, d_model = x.shape
    d_ff = w1.shape[1]
    out_dtype = x.dtype
    M = batch * seq

    # Feed the MXU in the weights' dtype (bf16 recommended); single cheap cast
    # of the activations in the wrapper.
    compute_dtype = w1.dtype
    compute_bytes = jnp.dtype(compute_dtype).itemsize
    out_bytes = jnp.dtype(out_dtype).itemsize
    x2d = x.reshape(M, d_model).astype(compute_dtype)

    # Pad d_model up to a multiple of 128 so all lane dimensions are dense
    # (unmasked vector stores).  Zero padding is a mathematical no-op here.
    Dp = _round_up(d_model, 128)
    if Dp != d_model:
        dpad = Dp - d_model
        x2d = jnp.pad(x2d, ((0, 0), (0, dpad)))
        w1 = jnp.pad(w1, ((0, dpad), (0, 0)))
        w2 = jnp.pad(w2, ((0, 0), (0, dpad)))
        b2 = jnp.pad(b2, ((0, 0), (0, dpad)))

    # Row tiling: clamp for tiny inputs, pad M up to a multiple of tm so the
    # large-tile fast path is kept (padded rows are discarded at the end).
    tm = max(8, min(tm, _round_up(M, 8)))
    Mp = _round_up(M, tm)
    if Mp != M:
        x2d = jnp.pad(x2d, ((0, Mp - M), (0, 0)))

    # d_ff chunking: stream weights in as few chunks as fit VMEM.
    # Zero-padding d_ff is safe: gelu(0 + 0) == 0, contributes nothing.
    if tff is None:
        tff = _auto_tff(Dp, d_ff, tm, compute_bytes, out_bytes)
    tff = max(128, min(_round_up(tff, 128), _round_up(d_ff, 128)))
    Fp = _round_up(d_ff, tff)
    if Fp != d_ff:
        fpad = Fp - d_ff
        w1 = jnp.pad(w1, ((0, 0), (0, fpad)))
        b1 = jnp.pad(b1, ((0, 0), (0, fpad)))
        w2 = jnp.pad(w2, ((0, fpad), (0, 0)))

    grid = (Mp // tm, Fp // tff)

    bytes_accessed = int(
        x2d.size * x2d.dtype.itemsize
        + M * d_model * out_bytes
        + w1.size * w1.dtype.itemsize + w2.size * w2.dtype.itemsize
        + b1.size * b1.dtype.itemsize + b2.size * b2.dtype.itemsize)
    cost = pl.CostEstimate(
        flops=4 * M * d_model * d_ff,
        transcendentals=M * d_ff,
        bytes_accessed=bytes_accessed,
    )

    out2d = pl.pallas_call(
        ffn_kernel,
        out_shape=jax.ShapeDtypeStruct((Mp, Dp), out_dtype),
        grid_spec=pltpu.PrefetchScalarGridSpec(
            num_scalar_prefetch=0,
            grid=grid,
            in_specs=[
                pl.BlockSpec((tm, Dp), lambda i, k: (i, 0)),     # x row tile
                pl.BlockSpec((Dp, tff), lambda i, k: (0, k)),    # W1 chunk
                pl.BlockSpec((1, tff), lambda i, k: (0, k)),     # b1 chunk
                pl.BlockSpec((tff, Dp), lambda i, k: (k, 0)),    # W2 chunk
                pl.BlockSpec((1, Dp), lambda i, k: (0, 0)),      # b2
            ],
            out_specs=pl.BlockSpec((tm, Dp), lambda i, k: (i, 0)),
            scratch_shapes=[pltpu.VMEM((tm, Dp), jnp.float32)],
        ),
        compiler_params=pltpu.CompilerParams(
            dimension_semantics=("parallel", "arbitrary"),
            vmem_limit_bytes=48 * 1024 * 1024,
        ),
        cost_estimate=cost,
    )(x2d, w1, b1, w2, b2)

    return out2d[:M, :d_model].reshape(batch, seq, d_model)


def init_params(key, d_model, d_ff,
                weight_dtype=jnp.bfloat16, bias_dtype=jnp.float32):
    """Deterministic init mirroring nn.Linear default (U(-1/sqrt(fan_in), .)).
    Weights stored pre-transposed (y = x @ W + b) and in bf16 for the MXU."""
    k1, k2, k3, k4 = jax.random.split(key, 4)
    bound1 = 1.0 / math.sqrt(d_model)
    bound2 = 1.0 / math.sqrt(d_ff)
    w1 = jax.random.uniform(k1, (d_model, d_ff), jnp.float32,
                            -bound1, bound1).astype(weight_dtype)
    b1 = jax.random.uniform(k2, (1, d_ff), jnp.float32,
                            -bound1, bound1).astype(bias_dtype)
    w2 = jax.random.uniform(k3, (d_ff, d_model), jnp.float32,
                            -bound2, bound2).astype(weight_dtype)
    b2 = jax.random.uniform(k4, (1, d_model), jnp.float32,
                            -bound2, bound2).astype(bias_dtype)
    return w1, b1, w2, b2


def reference(x2d, w1, b1, w2, b2, compute_dtype):
    # f32 reference using the same (bf16-rounded) inputs as the kernel.
    xf = x2d.astype(compute_dtype).astype(jnp.float32)
    h = xf @ w1.astype(jnp.float32) + b1.astype(jnp.float32)
    g = jax.nn.gelu(h, approximate=True)
    return g @ w2.astype(jnp.float32) + b2.astype(jnp.float32)


if __name__ == "__main__":
    # Small shapes; M=18 exercises the row-padding path, d_model=32 exercises
    # the lane-padding path, and the forced tff=128 run on d_ff=256 exercises
    # the d_ff-chunk accumulator path (the auto run uses a single chunk).
    batch, seq, d_model, d_ff = 2, 9, 32, 256

    key = jax.random.PRNGKey(0)
    kx, kp = jax.random.split(key)
    x = jax.random.normal(kx, (batch, seq, d_model), jnp.float32)
    w1, b1, w2, b2 = init_params(kp, d_model, d_ff)

    ref = reference(x.reshape(-1, d_model), w1, b1, w2, b2, w1.dtype)
    ref = ref.astype(x.dtype).reshape(x.shape)

    ok = True
    for forced_tff in (None, 128):   # auto (single chunk) and chunked paths
        out = feed_forward(x, w1, b1, w2, b2, tm=256, tff=forced_tff)
        out = jax.block_until_ready(out)
        assert out.shape == x.shape and out.dtype == x.dtype
        # bf16 matmul path (f32 accumulation) => relaxed tolerance vs f32 ref.
        ok = ok and bool(jnp.allclose(out, ref, atol=5e-2, rtol=5e-2))

    assert ok, "mismatch vs reference"
    print("KERNEL_OK")
</pallas_src>

<mosaic_0001>
module attributes {stable_mosaic.version = 11 : i64} {
  func.func @ffn_kernel(%arg0: i32, %arg1: i32, %arg2: memref<24x128xbf16, #tpu.memory_space<vmem>>, %arg3: memref<128x256xbf16, #tpu.memory_space<vmem>>, %arg4: memref<1x256xf32, #tpu.memory_space<vmem>>, %arg5: memref<256x128xbf16, #tpu.memory_space<vmem>>, %arg6: memref<1x128xf32, #tpu.memory_space<vmem>>, %arg7: memref<24x128xf32, #tpu.memory_space<vmem>>, %arg8: memref<24x128xf32, #tpu.memory_space<vmem>>) attributes {dimension_semantics = [#tpu.dimension_semantics<parallel>, #tpu.dimension_semantics<arbitrary>], iteration_bounds = array<i64: 1, 1>, scalar_prefetch = 0 : i64, scratch_operands = 1 : i64, tpu.core_type = #tpu.core_type<tc>, window_params = [{transform_indices = @transform_0, window_bounds = array<i64: 24, 128>}, {transform_indices = @transform_1, window_bounds = array<i64: 128, 256>}, {transform_indices = @transform_2, window_bounds = array<i64: 1, 256>}, {transform_indices = @transform_3, window_bounds = array<i64: 256, 128>}, {pipeline_mode = #tpu.pipeline_mode<synchronous>, transform_indices = @transform_4, window_bounds = array<i64: 1, 128>}, {transform_indices = @transform_5, window_bounds = array<i64: 24, 128>}]} {
    %c0_i32 = arith.constant 0 : i32
    %0 = arith.cmpi eq, %arg1, %c0_i32 : i32
    %1 = arith.extui %0 : i1 to i32
    %c0_i32_0 = arith.constant 0 : i32
    %2 = arith.cmpi ne, %1, %c0_i32_0 : i32
    scf.if %2 {
      %cst_19 = arith.constant 0.000000e+00 : f32
      %31 = vector.broadcast %cst_19 : f32 to vector<24x128xf32>
      %c0_20 = arith.constant 0 : index
      %c0_21 = arith.constant 0 : index
      %32 = vector.load %arg8[%c0_20, %c0_21] : memref<24x128xf32, #tpu.memory_space<vmem>>, vector<24x128xf32>
      tpu.vector_store %arg8[%c0_20, %c0_21], %31 {strides = array<i32>} : memref<24x128xf32, #tpu.memory_space<vmem>>, vector<24x128xf32>,
    } else {
    }
    %c0 = arith.constant 0 : index
    %c0_1 = arith.constant 0 : index
    %3 = vector.load %arg2[%c0, %c0_1] : memref<24x128xbf16, #tpu.memory_space<vmem>>, vector<24x128xbf16>
    %c0_2 = arith.constant 0 : index
    %c0_3 = arith.constant 0 : index
    %4 = vector.load %arg3[%c0_2, %c0_3] : memref<128x256xbf16, #tpu.memory_space<vmem>>, vector<128x256xbf16>
    %cst = arith.constant dense<0.000000e+00> : vector<24x256xf32>
    %5 = tpu.matmul %3, %4, %cst {dimension_numbers = #tpu.dot_dimension_numbers<[1], [0], [0], [1], [0, 0, 1, 1], [], []>} : vector<24x128xbf16>, vector<128x256xbf16>, vector<24x256xf32> -> vector<24x256xf32>
    %c0_4 = arith.constant 0 : index
    %c0_5 = arith.constant 0 : index
    %6 = vector.load %arg4[%c0_4, %c0_5] : memref<1x256xf32, #tpu.memory_space<vmem>>, vector<1x256xf32>
    %7 = vector.broadcast %6 : vector<1x256xf32> to vector<24x256xf32>
    %8 = arith.addf %5, %7 : vector<24x256xf32>
    %9 = arith.mulf %8, %8 : vector<24x256xf32>
    %10 = arith.mulf %8, %9 : vector<24x256xf32>
    %cst_6 = arith.constant 4.471500e-02 : f32
    %11 = vector.broadcast %cst_6 : f32 to vector<24x256xf32>
    %12 = arith.mulf %11, %10 : vector<24x256xf32>
    %13 = arith.addf %8, %12 : vector<24x256xf32>
    %cst_7 = arith.constant 0.797884583 : f32
    %14 = vector.broadcast %cst_7 : f32 to vector<24x256xf32>
    %15 = arith.mulf %14, %13 : vector<24x256xf32>
    %16 = math.tanh %15 : vector<24x256xf32>
    %cst_8 = arith.constant 1.000000e+00 : f32
    %17 = vector.broadcast %cst_8 : f32 to vector<24x256xf32>
    %18 = arith.addf %17, %16 : vector<24x256xf32>
    %cst_9 = arith.constant 5.000000e-01 : f32
    %19 = vector.broadcast %cst_9 : f32 to vector<24x256xf32>
    %20 = arith.mulf %19, %18 : vector<24x256xf32>
    %21 = arith.mulf %8, %20 : vector<24x256xf32>
    %c0_10 = arith.constant 0 : index
    %c0_11 = arith.constant 0 : index
    %22 = vector.load %arg8[%c0_10, %c0_11] : memref<24x128xf32, #tpu.memory_space<vmem>>, vector<24x128xf32>
    %23 = arith.truncf %21 : vector<24x256xf32> to vector<24x256xbf16>
    %c0_12 = arith.constant 0 : index
    %c0_13 = arith.constant 0 : index
    %24 = vector.load %arg5[%c0_12, %c0_13] : memref<256x128xbf16, #tpu.memory_space<vmem>>, vector<256x128xbf16>
    %cst_14 = arith.constant dense<0.000000e+00> : vector<24x128xf32>
    %25 = tpu.matmul %23, %24, %cst_14 {dimension_numbers = #tpu.dot_dimension_numbers<[1], [0], [0], [1], [0, 0, 1, 1], [], []>} : vector<24x256xbf16>, vector<256x128xbf16>, vector<24x128xf32> -> vector<24x128xf32>
    %26 = arith.addf %22, %25 : vector<24x128xf32>
    %c0_15 = arith.constant 0 : index
    %c0_16 = arith.constant 0 : index
    %27 = vector.load %arg8[%c0_15, %c0_16] : memref<24x128xf32, #tpu.memory_space<vmem>>, vector<24x128xf32>
    tpu.vector_store %arg8[%c0_15, %c0_16], %26 {strides = array<i32>} : memref<24x128xf32, #tpu.memory_space<vmem>>, vector<24x128xf32>,
    %c0_i32_17 = arith.constant 0 : i32
    %28 = arith.cmpi eq, %arg1, %c0_i32_17 : i32
    %29 = arith.extui %28 : i1 to i32
    %c0_i32_18 = arith.constant 0 : i32
    %30 = arith.cmpi ne, %29, %c0_i32_18 : i32
    scf.if %30 {
      %c0_19 = arith.constant 0 : index
      %c0_20 = arith.constant 0 : index
      %31 = vector.load %arg8[%c0_19, %c0_20] : memref<24x128xf32, #tpu.memory_space<vmem>>, vector<24x128xf32>
      %c0_21 = arith.constant 0 : index
      %c0_22 = arith.constant 0 : index
      %32 = vector.load %arg6[%c0_21, %c0_22] : memref<1x128xf32, #tpu.memory_space<vmem>>, vector<1x128xf32>
      %33 = vector.broadcast %32 : vector<1x128xf32> to vector<24x128xf32>
      %34 = arith.addf %31, %33 : vector<24x128xf32>
      %c0_23 = arith.constant 0 : index
      %c0_24 = arith.constant 0 : index
      %35 = vector.load %arg7[%c0_23, %c0_24] : memref<24x128xf32, #tpu.memory_space<vmem>>, vector<24x128xf32>
      tpu.vector_store %arg7[%c0_23, %c0_24], %34 {strides = array<i32>} : memref<24x128xf32, #tpu.memory_space<vmem>>, vector<24x128xf32>,
    } else {
    }
    return
  }
  func.func @transform_0(%arg0: i32, %arg1: i32) -> (i32, i32) {
    %c0_i32 = arith.constant 0 : i32
    %c0_i32_0 = arith.constant 0 : i32
    return %arg0, %c0_i32 : i32, i32
  }
  func.func @transform_1(%arg0: i32, %arg1: i32) -> (i32, i32) {
    %c0_i32 = arith.constant 0 : i32
    %c0_i32_0 = arith.constant 0 : i32
    return %c0_i32, %arg1 : i32, i32
  }
  func.func @transform_2(%arg0: i32, %arg1: i32) -> (i32, i32) {
    %c0_i32 = arith.constant 0 : i32
    %c0_i32_0 = arith.constant 0 : i32
    return %c0_i32, %arg1 : i32, i32
  }
  func.func @transform_3(%arg0: i32, %arg1: i32) -> (i32, i32) {
    %c0_i32 = arith.constant 0 : i32
    %c0_i32_0 = arith.constant 0 : i32
    return %arg1, %c0_i32 : i32, i32
  }
  func.func @transform_4(%arg0: i32, %arg1: i32) -> (i32, i32) {
    %c0_i32 = arith.constant 0 : i32
    %c0_i32_0 = arith.constant 0 : i32
    %c0_i32_1 = arith.constant 0 : i32
    return %c0_i32, %c0_i32_0 : i32, i32
  }
  func.func @transform_5(%arg0: i32, %arg1: i32) -> (i32, i32) {
    %c0_i32 = arith.constant 0 : i32
    %c0_i32_0 = arith.constant 0 : i32
    return %arg0, %c0_i32 : i32, i32
  }
}

</mosaic_0001>

<bundles_post_ra>
// kernel: tpu_custom_call.1
= control target key start
LH: loop header
LB: loop body
LE: loop exit
PB: predicated region body
PF: predicated region fallthrough
CT: control target
= control target key end

     0   :  { %10 = vsyncpa [#allocation4], 0  ;;  %s804_s0 = inlined_call_operand.hbm [shape: bf16[24,128], index: 0, kind: input, shape index: {}]   ;;  %s805_s1 = inlined_call_operand.hbm [shape: bf16[128,256], index: 1, kind: input, shape index: {}]   ;;  %s806_s2 = inlined_call_operand.vmem [shape: f32[1,256], index: 2, kind: input, shape index: {}]   ;;  %s807_s3 = inlined_call_operand.hbm [shape: bf16[256,128], index: 3, kind: input, shape index: {}]   ;;  %s808_s4 = inlined_call_operand.vmem [shape: f32[1,128], index: 4, kind: input, shape index: {}]   ;;  %s809_s5 = inlined_call_operand.hbm [shape: f32[24,128], index: 5, kind: output, shape index: {}]  }
   0x1   :  { %11 = vsyncpa [#allocation7], 0 }
   0x2   :  { %12 = vsyncpa [#allocation5], 0  ;;  %s734_s18 = smov [#allocation6]  }
   0x3   :  { %s30_s19 = sshll.u32 %s734_s18, 4  ;;  %s31_s19 = int_to_ptr.vmem [resolvable:$true] %s30_s19 }
   0x4   :  { %s656_s20 = scalar_lea.vmem %s31_s19, 2048  ;;  %p661_p1 = scmp.lt.s32.totalorder %s31_s19, %s31_s19 }
   0x5   :  { %p657_p0 = scmp.ne.s32.totalorder %s31_s19, %s656_s20  ;;  %p662_p2 = scmp.lt.s32.totalorder %s656_s20, %s656_s20 }
   0x7   :  { %p663_p3 = por %p662_p2, %p661_p1 }
   0x9   :  { %p664_p4 = pnand %p663_p3, %p657_p0 }
   0xb   :  { %667 = shalt.err (!%p664_p4)
}
   0xc   :  { %s735_s21 = smov 128   ;;  %s736_s22 = smov 8  }
   0xd   :  { %36 = dma.hbm_to_vmem [thread:$0]  %s805_s1, 2048, %s31_s19, [#allocation7], %s735_s21, %s735_s21, %s736_s22  }
   0xe   :  { %s737_s25 = smov [#allocation3]  }
   0xf   :  { %s18_s26 = sshll.u32 %s737_s25, 4  ;;  %s19_s26 = int_to_ptr.vmem [resolvable:$true] %s18_s26 }
  0x10   :  { %s676_s27 = scalar_lea.vmem %s19_s26, 192  ;;  %p681_p6 = scmp.lt.s32.totalorder %s19_s26, %s19_s26 }
  0x11   :  { %p677_p5 = scmp.ne.s32.totalorder %s19_s26, %s676_s27  ;;  %p682_p7 = scmp.lt.s32.totalorder %s676_s27, %s676_s27 }
  0x13   :  { %p683_p8 = por %p682_p7, %p681_p6 }
  0x15   :  { %p684_p9 = pnand %p683_p8, %p677_p5 }
  0x17   :  { %687 = shalt.err (!%p684_p9)
}
  0x18   :  { %s738_s28 = smov 64   ;;  %s739_s29 = smov 4  }
  0x19   :  { %24 = dma.hbm_to_vmem [thread:$0]  %s804_s0, 192, %s19_s26, [#allocation4], %s738_s28, %s738_s28, %s739_s29  }
  0x1a   :  { %s740_s7 = smov [#allocation8]  }
  0x1b   :  { %s44_s8 = sshll.u32 %s740_s7, 4  ;;  %s45_s8 = int_to_ptr.vmem [resolvable:$true] %s44_s8 }
  0x1c   :  { %s696_s1 = scalar_lea.vmem %s45_s8, 2048  ;;  %p701_p11 = scmp.lt.s32.totalorder %s45_s8, %s45_s8 }
  0x1d   :  { %p697_p10 = scmp.ne.s32.totalorder %s45_s8, %s696_s1  ;;  %p702_p12 = scmp.lt.s32.totalorder %s696_s1, %s696_s1 }
  0x1f   :  { %p703_p13 = por %p702_p12, %p701_p11 }
  0x21   :  { %p704_p0 = pnand %p703_p13, %p697_p10 }
  0x23   :  { %707 = shalt.err (!%p704_p0)
}
  0x24   :  { %50 = dma.hbm_to_vmem [thread:$0]  %s807_s3, 2048, %s45_s8, [#allocation7], %s738_s28, %s738_s28, %s739_s29  }
  0x25   :  { %728 = dma.done.wait [#allocation4], 192  }
  0x26   :  { %729 = vsyncadd [#allocation4], 4294967104 }
  0x27   :  { %730 = dma.done.wait [#allocation7], 4096  }
  0x28   :  { %731 = vsyncadd [#allocation7], 4294963200  ;;  %v741_v0 = vmov 0   ;;  %v594_v1 = vld [vmem:[#allocation6 + $0x74] ss:$8 sps:$4 sm:$0xff]   ;;  %v624_v23 = vld [vmem:[#allocation8 + $0x68] sm:$0xff]   ;;  %v91_v35 = vlaneseq }
  0x29   :  { %223 = vmatprep.mubr.bf16.mxu0 %v741_v0  ;;  %v596_v2 = vld [vmem:[#allocation6 + $0x70] ss:$8 sps:$4 sm:$0xff]   ;;  %191 = vmatprep.subr.bf16.mxu0 %v594_v1  ;;  %v597_v3 = vld [vmem:[#allocation6 + $0x64] ss:$8 sps:$4 sm:$0xff]   ;;  %v599_v4 = vld [vmem:[#allocation6 + $0x60] ss:$8 sps:$4 sm:$0xff]  }
  0x2a   :  { %192 = vmatpush1.bf16.msra.mxu0 %v596_v2  ;;  %v600_v5 = vld [vmem:[#allocation6 + $0x54] ss:$8 sps:$4 sm:$0xff]   ;;  %v602_v6 = vld [vmem:[#allocation6 + $0x50] ss:$8 sps:$4 sm:$0xff]   ;;  %v603_v7 = vld [vmem:[#allocation6 + $0x44] ss:$8 sps:$4 sm:$0xff]  }
  0x2b   :  { %193 = vmatprep.subr.bf16.mxu0 %v597_v3  ;;  %v605_v8 = vld [vmem:[#allocation6 + $0x40] ss:$8 sps:$4 sm:$0xff]   ;;  %v606_v9 = vld [vmem:[#allocation6 + $0x34] ss:$8 sps:$4 sm:$0xff]   ;;  %v608_v10 = vld [vmem:[#allocation6 + $0x30] ss:$8 sps:$4 sm:$0xff]  }
  0x2c   :  { %v609_v11 = vld [vmem:[#allocation6 + $0x24] ss:$8 sps:$4 sm:$0xff]   ;;  %v611_v12 = vld [vmem:[#allocation6 + $0x20] ss:$8 sps:$4 sm:$0xff]   ;;  %v612_v13 = vld [vmem:[#allocation6 + $0x14] ss:$8 sps:$4 sm:$0xff]  }
  0x2d   :  { %v614_v14 = vld [vmem:[#allocation6 + $0x10] ss:$8 sps:$4 sm:$0xff]   ;;  %v615_v15 = vld [vmem:[#allocation6 + $0x4] ss:$8 sps:$4 sm:$0xff]   ;;  %v617_v16 = vld [vmem:[#allocation6] ss:$8 sps:$4 sm:$0xff]  }
  0x2e   :  { %194 = vmatpush1.bf16.msra.mxu0 %v599_v4  ;;  %v618_v17 = vld [vmem:[#allocation3] sm:$0xff]   ;;  %v619_v18 = vld [vmem:[#allocation3 + $0x8] ss:$0 sps:$4 sm:$0xff]   ;;  %v625_v24 = vld [vmem:[#allocation8 + $0x28] sm:$0xff]   ;;  %v92_v36 = vshrl.u32 %v91_v35, 7  ;;  %s742_s12 = smov [#allocation9]  }
  0x2f   :  { %195 = vmatprep.subr.bf16.mxu0 %v600_v5  ;;  %v620_v19 = vld [vmem:[#allocation8 + $0x78] sm:$0xff]   ;;  %v622_v21 = vld [vmem:[#allocation8 + $0x70] sm:$0xff]   ;;  %v626_v25 = vld [vmem:[#allocation8 + $0x60] sm:$0xff]   ;;  %s509_s13 = sshll.u32 %s742_s12, 4  ;;  %s510_s13 = int_to_ptr.vmem [resolvable:$true] %s509_s13 }
  0x30   :  { %v621_v20 = vld [vmem:[#allocation8 + $0x38] sm:$0xff]   ;;  %557 = vmatprep.subr.bf16.mxu1 %v620_v19  ;;  %v623_v22 = vld [vmem:[#allocation8 + $0x30] sm:$0xff]   ;;  %v627_v26 = vld [vmem:[#allocation8 + $0x20] sm:$0xff]   ;;  %v93_v37 = vsub.s32 0, %v92_v36  ;;  %v97_v39 = vsub.s32 1, %v92_v36  ;;  %s708_s14 = scalar_lea.vmem %s510_s13, 384  ;;  %p713_p2 = scmp.lt.s32.totalorder %s510_s13, %s510_s13 }
  0x31   :  { %558 = vmatpush3.bf16.msra.mxu1 %v621_v20  ;;  %v628_v27 = vld [vmem:[#allocation8 + $0x58] sm:$0xff]   ;;  %v630_v29 = vld [vmem:[#allocation8 + $0x50] sm:$0xff]   ;;  %v632_v31 = vld [vmem:[#allocation8 + $0x48] sm:$0xff]   ;;  %p709_p1 = scmp.ne.s32.totalorder %s510_s13, %s708_s14  ;;  %p714_p3 = scmp.lt.s32.totalorder %s708_s14, %s708_s14 }
  0x32   :  { %196 = vmatpush1.bf16.msra.mxu0 %v602_v6  ;;  %559 = vmatprep.subr.bf16.mxu1 %v622_v21  ;;  %v629_v28 = vld [vmem:[#allocation8 + $0x18] sm:$0xff]   ;;  %v631_v30 = vld [vmem:[#allocation8 + $0x10] sm:$0xff]   ;;  %v633_v32 = vld [vmem:[#allocation8 + $0x8] sm:$0xff]  }
  0x33   :  { %197 = vmatprep.subr.bf16.mxu0 %v603_v7  ;;  %v634_v33 = vld [vmem:[#allocation8 + $0x40] sm:$0xff]   ;;  %v89_v38 = vld [vmem:[%s806_s2] sm:$0x3]  ;;  %p715_p4 = por %p714_p3, %p713_p2 }
  0x34   :  { %v635_v34 = vld [vmem:[#allocation8] sm:$0xff]   ;;  %v94_v40 = vrot.slane %v89_v38, %v93_v37  ;;  %v98_v41 = vrot.slane %v89_v38, %v97_v39 }
  0x35   :  { %560 = vmatpush3.bf16.msra.mxu1 %v623_v22  ;;  %p716_p5 = pnand %p715_p4, %p709_p1 }
  0x36   :  { %198 = vmatpush1.bf16.msra.mxu0 %v605_v8  ;;  %561 = vmatprep.subr.bf16.mxu1 %v624_v23 }
  0x37   :  { %199 = vmatprep.subr.bf16.mxu0 %v606_v9 }
  0x39   :  { %562 = vmatpush3.bf16.msra.mxu1 %v625_v24 }
  0x3a   :  { %200 = vmatpush1.bf16.msra.mxu0 %v608_v10  ;;  %563 = vmatprep.subr.bf16.mxu1 %v626_v25 }
  0x3b   :  { %201 = vmatprep.subr.bf16.mxu0 %v609_v11 }
  0x3d   :  { %564 = vmatpush3.bf16.msra.mxu1 %v627_v26 }
  0x3e   :  { %202 = vmatpush1.bf16.msra.mxu0 %v611_v12  ;;  %565 = vmatprep.subr.bf16.mxu1 %v628_v27 }
  0x3f   :  { %203 = vmatprep.subr.bf16.mxu0 %v612_v13 }
  0x41   :  { %566 = vmatpush3.bf16.msra.mxu1 %v629_v28 }
  0x42   :  { %204 = vmatpush1.bf16.msra.mxu0 %v614_v14  ;;  %567 = vmatprep.subr.bf16.mxu1 %v630_v29 }
  0x43   :  { %205 = vmatprep.subr.bf16.mxu0 %v615_v15 }
  0x45   :  { %568 = vmatpush3.bf16.msra.mxu1 %v631_v30 }
  0x46   :  { %206 = vmatpush1.bf16.msra.mxu0 %v617_v16  ;;  %569 = vmatprep.subr.bf16.mxu1 %v632_v31 }
  0x49   :  { %224 = vmatmul.mubr.bf16.vlgmr.msra.gmra.mxu0 %v618_v17  ;;  %570 = vmatpush3.bf16.msra.mxu1 %v633_v32 }
  0x4a   :  { %233 = vmatprep.mubr.bf16.mxu0 %v741_v0  ;;  %571 = vmatprep.subr.bf16.mxu1 %v634_v33 }
  0x4d   :  { %572 = vmatpush3.bf16.msra.mxu1 %v635_v34 }
  0x51   :  { %234 = vmatmul.mubr.bf16.gmra.mxu0 %v619_v18 }
 0x109   :  { %v225_v42 = vpop.f32.mrf.mxu0 }
 0x10a   :  { %v788_v43 = vadd.f32 %v225_v42, %v94_v40 }
 0x10b   :  { %v227_v44 = vpop.f32.mrf.mxu0 }
 0x10c   :  { %v242_v45 = vmul.f32 %v788_v43, %v788_v43  ;;  %v228_v46 = vadd.f32 %v227_v44, %v98_v41 }
 0x10d   :  { %v229_v47 = vpop.f32.mrf.mxu0 }
 0x10e   :  { %v248_v48 = vmul.f32 %v242_v45, %v788_v43  ;;  %v243_v49 = vmul.f32 %v228_v46, %v228_v46  ;;  %v230_v50 = vadd.f32 %v229_v47, %v94_v40 }
 0x10f   :  { %v231_v51 = vpop.f32.mrf.mxu0 }
 0x110   :  { %v254_v52 = vmul.f32 0.044715, %v248_v48  ;;  %v249_v53 = vmul.f32 %v243_v49, %v228_v46  ;;  %v244_v54 = vmul.f32 %v230_v50, %v230_v50  ;;  %v232_v55 = vadd.f32 %v231_v51, %v98_v41 }
 0x111   :  { %v235_v56 = vpop.f32.mrf.mxu0 }
 0x112   :  { %v260_v57 = vadd.f32 %v254_v52, %v788_v43  ;;  %v255_v58 = vmul.f32 0.044715, %v249_v53  ;;  %v250_v59 = vmul.f32 %v244_v54, %v230_v50  ;;  %v245_v60 = vmul.f32 %v232_v55, %v232_v55 }
 0x113   :  { %v236_v61 = vadd.f32 %v235_v56, %v94_v40  ;;  %v237_v62 = vpop.f32.mrf.mxu0 }
 0x114   :  { %v266_v63 = vmul.f32 0.7978846, %v260_v57  ;;  %v261_v0 = vadd.f32 %v255_v58, %v228_v46  ;;  %v256_v1 = vmul.f32 0.044715, %v250_v59  ;;  %v251_v2 = vmul.f32 %v245_v60, %v232_v55 }
 0x115   :  { %v246_v3 = vmul.f32 %v236_v61, %v236_v61  ;;  %v238_v4 = vadd.f32 %v237_v62, %v98_v41  ;;  %v239_v5 = vpop.f32.mrf.mxu0 }
 0x116   :  { %v262_v6 = vadd.f32 %v256_v1, %v230_v50  ;;  %v257_v7 = vmul.f32 0.044715, %v251_v2  ;;  %v267_v8 = vmul.f32 0.7978846, %v261_v0  ;;  %636 = vtanh.f32 %v266_v63 }
 0x117   :  { %v252_v9 = vmul.f32 %v246_v3, %v236_v61  ;;  %v247_v10 = vmul.f32 %v238_v4, %v238_v4  ;;  %v240_v11 = vpop.f32.mrf.mxu0 }
 0x118   :  { %v268_v12 = vmul.f32 0.7978846, %v262_v6  ;;  %v263_v13 = vadd.f32 %v257_v7, %v232_v55  ;;  %638 = vtanh.f32 %v267_v8 }
 0x119   :  { %v258_v14 = vmul.f32 0.044715, %v252_v9  ;;  %v253_v15 = vmul.f32 %v247_v10, %v238_v4 }
 0x11a   :  { %640 = vtanh.f32 %v268_v12  ;;  %v269_v16 = vmul.f32 0.7978846, %v263_v13 }
 0x11b   :  { %v264_v17 = vadd.f32 %v258_v14, %v236_v61  ;;  %v259_v18 = vmul.f32 0.044715, %v253_v15 }
 0x11c   :  { %642 = vtanh.f32 %v269_v16 }
 0x11d   :  { %v270_v19 = vmul.f32 0.7978846, %v264_v17  ;;  %v265_v20 = vadd.f32 %v259_v18, %v238_v4 }
 0x11f   :  { %644 = vtanh.f32 %v270_v19  ;;  %v271_v21 = vmul.f32 0.7978846, %v265_v20 }
 0x121   :  { %646 = vtanh.f32 %v271_v21 }
 0x123   :  { %v637_v22 = vpop.eup %636 }
 0x124   :  { %v278_v26 = vadd.f32 1.0, %v637_v22 }
 0x125   :  { %v639_v23 = vpop.eup %638 }
 0x126   :  { %v279_v24 = vadd.f32 1.0, %v639_v23  ;;  %v284_v32 = vmul.f32 0.5, %v278_v26 }
 0x127   :  { %v641_v25 = vpop.eup %640 }
 0x128   :  { %v280_v27 = vadd.f32 1.0, %v641_v25  ;;  %v285_v30 = vmul.f32 0.5, %v279_v24  ;;  %v290_v40 = vmul.f32 %v284_v32, %v788_v43 }
 0x129   :  { %v643_v28 = vpop.eup %642 }
 0x12a   :  { %v281_v29 = vadd.f32 1.0, %v643_v28  ;;  %v286_v31 = vmul.f32 0.5, %v280_v27  ;;  %v291_v38 = vmul.f32 %v285_v30, %v228_v46  ;;  %v556_v46 = vld [vmem:[%s808_s4] ss:$0 sm:$0xff] }
 0x12c   :  { %v645_v33 = vpop.eup %644  ;;  %v287_v34 = vmul.f32 0.5, %v281_v29  ;;  %v292_v35 = vmul.f32 %v286_v31, %v230_v50 }
 0x12d   :  { %v282_v36 = vadd.f32 1.0, %v645_v33 }
 0x12e   :  { %v647_v37 = vpop.eup %646  ;;  %v293_v39 = vmul.f32 %v287_v34, %v232_v55  ;;  %v299_v44 = vpack.c.bf16 %v292_v35, %v290_v40 }
 0x12f   :  { %v283_v41 = vadd.f32 1.0, %v647_v37  ;;  %v288_v47 = vmul.f32 0.5, %v282_v36 }
 0x130   :  { %v300_v42 = vpack.c.bf16 %v293_v39, %v291_v38 }
 0x131   :  { %v289_v45 = vmul.f32 0.5, %v283_v41  ;;  %v294_v51 = vmul.f32 %v288_v47, %v236_v61 }
 0x132   :  { %463 = vmatprep.mubr.bf16.mxu1 %v300_v42 }
 0x133   :  { %464 = vmatmul.mubr.bf16.vlgmr.msra.gmra.mxu1 %v299_v44  ;;  %v295_v48 = vmul.f32 %v289_v45, %v238_v4  ;;  %v301_v52 = vpack.c.bf16 %v294_v51, %v294_v51 }
 0x135   :  { %v302_v49 = vpack.c.bf16 %v295_v48, %v295_v48 }
 0x137   :  { %471 = vmatprep.mubr.bf16.mxu1 %v302_v49 }
 0x13b   :  { %472 = vmatmul.mubr.bf16.gmra.mxu1 %v301_v52 }
 0x1f3   :  { %v573_v50 = vpop.f32.mrf.mxu1 }
 0x1f5   :  { %v574_v53 = vpop.f32.mrf.mxu1 }
 0x1f6   :  { %v575_v43 = vadd.f32 %v574_v53, %v573_v50 }
 0x1f7   :  { %v576_v54 = vpop.f32.mrf.mxu1 }
 0x1f8   :  { %v498_v55 = vadd.f32 %v575_v43, %v556_v46 }
 0x1f9   :  { %v577_v56 = vpop.f32.mrf.mxu1 }
 0x1fa   :  { %501 = vst [vmem:[#allocation9] sm:$0xff] %v498_v55  ;;  %v578_v57 = vadd.f32 %v577_v56, %v576_v54 }
 0x1fb   :  { %v579_v58 = vpop.f32.mrf.mxu1 }
 0x1fc   :  { %v499_v59 = vadd.f32 %v578_v57, %v556_v46 }
 0x1fd   :  { %v580_v60 = vpop.f32.mrf.mxu1 }
 0x1fe   :  { %502 = vst [vmem:[#allocation9 + $0x8] sm:$0xff] %v499_v59  ;;  %v581_v61 = vadd.f32 %v580_v60, %v579_v58 }
 0x1ff   :  { %v582_v62 = vpop.f32.mrf.mxu1 }
 0x200   :  { %v500_v63 = vadd.f32 %v581_v61, %v556_v46 }
 0x201   :  { %v583_v0 = vpop.f32.mrf.mxu1 }
 0x202   :  { %503 = vst [vmem:[#allocation9 + $0x10] sm:$0xff] %v500_v63 }
 0x203   :  { %719 = shalt.err (!%p716_p5)
}
 0x204   :  { %515 = dma.vmem_to_hbm [thread:$0]  %s510_s13, 384, %s809_s5, [#allocation5], %s735_s21, %s735_s21, %s736_s22  }
 0x205   :  { %732 = dma.done.wait [#allocation5], 384  }
 0x206   :  { %733 = vsyncadd [#allocation5], 4294966912 }
 0x207   :  { %519 = vsyncpa [#allocation4], 1 }
 0x208   :  { %520 = vsyncpa [#allocation7], 1 }
 0x209   :  { %521 = vsyncpa [#allocation5], 1 }

</bundles_post_ra>
